<compile_context>
chip_gen: v6e
topology: v6e:2x2x1
jax: 0.10.0
libtpu: 0.0.40
codegen_flags: <defaults>
</compile_context>

<pallas_src>
import functools
import math

import jax
import jax.numpy as jnp
from jax.experimental import pallas as pl
from jax.experimental.pallas import tpu as pltpu

_EPS = 1e-5
_NEG_SLOPE = 0.01  # nn.LeakyReLU default
_LANE = 128


# ---------------------------------------------------------------------------
# Fused per-graph kernel (one grid step == one graph)
# ---------------------------------------------------------------------------
def _gcn_fused_kernel(x_ref, adj_ref, w1_ref, w2_ref, w3_ref,
                      g1_ref, b1_ref, g2_ref, b2_ref, o_ref, *, inv_n):
    adj = adj_ref[...]  # resident for all three layers of this graph

    def bn_lrelu(h, gamma, beta):
        # Two-pass (centered) batch stats over the node axis; folded scale/shift.
        mean = jnp.sum(h, axis=0, keepdims=True) * inv_n
        c = h - mean
        var = jnp.sum(c * c, axis=0, keepdims=True) * inv_n
        scale = gamma * jax.lax.rsqrt(var + _EPS)          # [1, F]
        h_bn = c * scale + beta                            # 2 broadcast VPU ops
        return jnp.maximum(h_bn, _NEG_SLOPE * h_bn)        # LeakyReLU (mul+max)

    # Layer 1: h1 = LeakyReLU(BN(adj @ (x0 @ W1)))
    h = jnp.dot(x_ref[...], w1_ref[...], preferred_element_type=jnp.float32)
    h = jnp.dot(adj, h, preferred_element_type=jnp.float32)
    h = bn_lrelu(h, g1_ref[...], b1_ref[...])

    # Layer 2 (hidden width zero-padded to 128 lanes): h2 = LeakyReLU(BN(adj @ (h1 @ W2p)))
    h = jnp.dot(h, w2_ref[...], preferred_element_type=jnp.float32)
    h = jnp.dot(adj, h, preferred_element_type=jnp.float32)
    h = bn_lrelu(h, g2_ref[...], b2_ref[...])

    # Layer 3: h3 = adj @ (h2 @ W3p)   (W3 zero-padded -> dense 128-lane vst)
    h = jnp.dot(h, w3_ref[...], preferred_element_type=jnp.float32)
    o_ref[...] = jnp.dot(adj, h, preferred_element_type=jnp.float32)


# ---------------------------------------------------------------------------
# Wrapper (jitted: pad-free, one pallas_call, slice folded by XLA)
# ---------------------------------------------------------------------------
@functools.partial(jax.jit, static_argnames="n_clusters")
def gcn_forward(x0, adj, params, *, n_clusters):
    w1, w2p, w3p, g1, b1, g2p, b2p = params
    B, n, f_in = x0.shape
    fout_pad = w3p.shape[1]

    kernel = functools.partial(_gcn_fused_kernel, inv_n=1.0 / n)

    def graph_spec(f):
        # One graph per grid step; leading batch dim squeezed away in-kernel.
        return pl.BlockSpec((None, n, f), lambda b: (b, 0, 0))

    def resident_spec(shape):
        # Weights / BN params: same block every step -> stays resident in VMEM.
        return pl.BlockSpec(shape, lambda b: tuple(0 for _ in shape))

    out = pl.pallas_call(
        kernel,
        out_shape=jax.ShapeDtypeStruct((B, n, fout_pad), jnp.float32),
        grid=(B,),
        in_specs=[
            graph_spec(f_in),            # x0  [B, N, 144]
            graph_spec(n),               # adj [B, N, N]
            resident_spec(w1.shape),
            resident_spec(w2p.shape),
            resident_spec(w3p.shape),
            resident_spec(g1.shape),
            resident_spec(b1.shape),
            resident_spec(g2p.shape),
            resident_spec(b2p.shape),
        ],
        out_specs=graph_spec(fout_pad),
        compiler_params=pltpu.CompilerParams(
            dimension_semantics=("parallel",)),
    )(x0, adj, w1, w2p, w3p, g1, b1, g2p, b2p)

    return out[:, :, :n_clusters]


# ---------------------------------------------------------------------------
# Parameter init (matches GraphConvolution.reset_parameters: U(-stdv, stdv),
# stdv = 1/sqrt(out_features); BatchNorm1d: gamma=1, beta=0).
# All lane padding is done HERE, once, not per forward call.
# ---------------------------------------------------------------------------
def init_gcn_params(key, n_clusters):
    dims = [(144, 128), (128, 64), (64, n_clusters)]
    keys = jax.random.split(key, len(dims))
    ws = []
    for k, (fin, fout) in zip(keys, dims):
        stdv = 1.0 / math.sqrt(fout)
        ws.append(jax.random.uniform(k, (fin, fout), jnp.float32,
                                     minval=-stdv, maxval=stdv))
    w1, w2, w3 = ws

    # Pad hidden-2 width 64 -> 128 and output width n_clusters -> 128 so every
    # intermediate is lane-dense. Zero pads are numerically inert: padded h2
    # columns are exactly 0 and W3p has zero rows there.
    h2_pad = _LANE
    fout_pad = max(_LANE, pl.cdiv(n_clusters, _LANE) * _LANE)
    w2p = jnp.zeros((w2.shape[0], h2_pad), jnp.float32).at[:, :w2.shape[1]].set(w2)
    w3p = jnp.zeros((h2_pad, fout_pad), jnp.float32).at[:w3.shape[0], :n_clusters].set(w3)

    g1 = jnp.ones((1, 128), jnp.float32)
    b1 = jnp.zeros((1, 128), jnp.float32)
    g2p = jnp.ones((1, h2_pad), jnp.float32)
    b2p = jnp.zeros((1, h2_pad), jnp.float32)

    return (w1, w2p, w3p, g1, b1, g2p, b2p)


# TODO(synk): BatchNorm1d running_mean/running_var tracking (eval-mode parity)
# is not implemented; only the training-mode batch-stat forward is computed.


# ---------------------------------------------------------------------------
# Main
# ---------------------------------------------------------------------------
if __name__ == "__main__":
    key = jax.random.PRNGKey(0)
    k_x, k_adj, k_params = jax.random.split(key, 3)

    B = 4            # graphs per call (batched grid axis)
    N = 16           # nodes per graph (BatchNorm batch dim)
    N_CLUSTERS = 8   # cfg['n_clusters']

    x0 = jax.random.normal(k_x, (B, N, 144), jnp.float32)

    # Symmetric row-normalized-ish adjacency per graph (deterministic, synthetic).
    a = jax.random.uniform(k_adj, (B, N, N), jnp.float32)
    a = 0.5 * (a + jnp.swapaxes(a, -1, -2)) + jnp.eye(N, dtype=jnp.float32)
    adj = a / jnp.sum(a, axis=-1, keepdims=True)

    params = init_gcn_params(k_params, N_CLUSTERS)
    params = jax.block_until_ready(params)  # padding materialized once, up front

    out = gcn_forward(x0, adj, params, n_clusters=N_CLUSTERS)
    out = jax.block_until_ready(out)
    assert out.shape == (B, N, N_CLUSTERS)
    assert bool(jnp.all(jnp.isfinite(out)))
    print("KERNEL_OK")
</pallas_src>

<mosaic_0001>
module attributes {stable_mosaic.version = 11 : i64} {
  func.func @_gcn_fused_kernel(%arg0: i32, %arg1: memref<1x16x144xf32, #tpu.memory_space<vmem>>, %arg2: memref<1x16x16xf32, #tpu.memory_space<vmem>>, %arg3: memref<144x128xf32, #tpu.memory_space<vmem>>, %arg4: memref<128x128xf32, #tpu.memory_space<vmem>>, %arg5: memref<128x128xf32, #tpu.memory_space<vmem>>, %arg6: memref<1x128xf32, #tpu.memory_space<vmem>>, %arg7: memref<1x128xf32, #tpu.memory_space<vmem>>, %arg8: memref<1x128xf32, #tpu.memory_space<vmem>>, %arg9: memref<1x128xf32, #tpu.memory_space<vmem>>, %arg10: memref<1x16x128xf32, #tpu.memory_space<vmem>>) attributes {dimension_semantics = [#tpu.dimension_semantics<parallel>], iteration_bounds = array<i64: 4>, scalar_prefetch = 0 : i64, scratch_operands = 0 : i64, tpu.core_type = #tpu.core_type<tc>, window_params = [{transform_indices = @transform_0, window_bounds = array<i64: 1, 16, 144>}, {transform_indices = @transform_1, window_bounds = array<i64: 1, 16, 16>}, {pipeline_mode = #tpu.pipeline_mode<synchronous>, transform_indices = @transform_2, window_bounds = array<i64: 144, 128>}, {pipeline_mode = #tpu.pipeline_mode<synchronous>, transform_indices = @transform_3, window_bounds = array<i64: 128, 128>}, {pipeline_mode = #tpu.pipeline_mode<synchronous>, transform_indices = @transform_4, window_bounds = array<i64: 128, 128>}, {pipeline_mode = #tpu.pipeline_mode<synchronous>, transform_indices = @transform_5, window_bounds = array<i64: 1, 128>}, {pipeline_mode = #tpu.pipeline_mode<synchronous>, transform_indices = @transform_6, window_bounds = array<i64: 1, 128>}, {pipeline_mode = #tpu.pipeline_mode<synchronous>, transform_indices = @transform_7, window_bounds = array<i64: 1, 128>}, {pipeline_mode = #tpu.pipeline_mode<synchronous>, transform_indices = @transform_8, window_bounds = array<i64: 1, 128>}, {transform_indices = @transform_9, window_bounds = array<i64: 1, 16, 128>}]} {
    %c0 = arith.constant 0 : index
    %c0_0 = arith.constant 0 : index
    %c0_1 = arith.constant 0 : index
    %0 = vector.load %arg2[%c0, %c0_0, %c0_1] : memref<1x16x16xf32, #tpu.memory_space<vmem>>, vector<1x16x16xf32>
    %1 = vector.shape_cast %0 : vector<1x16x16xf32> to vector<16x16xf32>
    %c0_2 = arith.constant 0 : index
    %c0_3 = arith.constant 0 : index
    %c0_4 = arith.constant 0 : index
    %2 = vector.load %arg1[%c0_2, %c0_3, %c0_4] : memref<1x16x144xf32, #tpu.memory_space<vmem>>, vector<1x16x144xf32>
    %3 = vector.shape_cast %2 : vector<1x16x144xf32> to vector<16x144xf32>
    %c0_5 = arith.constant 0 : index
    %c0_6 = arith.constant 0 : index
    %4 = vector.load %arg3[%c0_5, %c0_6] : memref<144x128xf32, #tpu.memory_space<vmem>>, vector<144x128xf32>
    %cst = arith.constant dense<0.000000e+00> : vector<16x128xf32>
    %5 = tpu.matmul %3, %4, %cst {dimension_numbers = #tpu.dot_dimension_numbers<[1], [0], [0], [1], [0, 0, 1, 1], [], []>} : vector<16x144xf32>, vector<144x128xf32>, vector<16x128xf32> -> vector<16x128xf32>
    %cst_7 = arith.constant dense<0.000000e+00> : vector<16x128xf32>
    %6 = tpu.matmul %1, %5, %cst_7 {dimension_numbers = #tpu.dot_dimension_numbers<[1], [0], [0], [1], [0, 0, 1, 1], [], []>} : vector<16x16xf32>, vector<16x128xf32>, vector<16x128xf32> -> vector<16x128xf32>
    %c0_8 = arith.constant 0 : index
    %c0_9 = arith.constant 0 : index
    %7 = vector.load %arg6[%c0_8, %c0_9] : memref<1x128xf32, #tpu.memory_space<vmem>>, vector<1x128xf32>
    %c0_10 = arith.constant 0 : index
    %c0_11 = arith.constant 0 : index
    %8 = vector.load %arg7[%c0_10, %c0_11] : memref<1x128xf32, #tpu.memory_space<vmem>>, vector<1x128xf32>
    %cst_12 = arith.constant dense<0.000000e+00> : vector<128xf32>
    %9 = vector.multi_reduction <add>, %6, %cst_12 [0] : vector<16x128xf32> to vector<128xf32>
    %10 = vector.shape_cast %9 : vector<128xf32> to vector<1x128xf32>
    %cst_13 = arith.constant 6.250000e-02 : f32
    %11 = vector.broadcast %cst_13 : f32 to vector<1x128xf32>
    %12 = arith.mulf %10, %11 : vector<1x128xf32>
    %13 = vector.broadcast %12 : vector<1x128xf32> to vector<16x128xf32>
    %14 = arith.subf %6, %13 : vector<16x128xf32>
    %15 = arith.mulf %14, %14 : vector<16x128xf32>
    %cst_14 = arith.constant dense<0.000000e+00> : vector<128xf32>
    %16 = vector.multi_reduction <add>, %15, %cst_14 [0] : vector<16x128xf32> to vector<128xf32>
    %17 = vector.shape_cast %16 : vector<128xf32> to vector<1x128xf32>
    %cst_15 = arith.constant 6.250000e-02 : f32
    %18 = vector.broadcast %cst_15 : f32 to vector<1x128xf32>
    %19 = arith.mulf %17, %18 : vector<1x128xf32>
    %cst_16 = arith.constant 9.99999974E-6 : f32
    %20 = vector.broadcast %cst_16 : f32 to vector<1x128xf32>
    %21 = arith.addf %19, %20 : vector<1x128xf32>
    %22 = math.rsqrt %21 : vector<1x128xf32>
    %23 = arith.mulf %7, %22 : vector<1x128xf32>
    %24 = vector.broadcast %23 : vector<1x128xf32> to vector<16x128xf32>
    %25 = arith.mulf %14, %24 : vector<16x128xf32>
    %26 = vector.broadcast %8 : vector<1x128xf32> to vector<16x128xf32>
    %27 = arith.addf %25, %26 : vector<16x128xf32>
    %cst_17 = arith.constant 0.00999999977 : f32
    %28 = vector.broadcast %cst_17 : f32 to vector<16x128xf32>
    %29 = arith.mulf %28, %27 : vector<16x128xf32>
    %30 = arith.maximumf %27, %29 : vector<16x128xf32>
    %c0_18 = arith.constant 0 : index
    %c0_19 = arith.constant 0 : index
    %31 = vector.load %arg4[%c0_18, %c0_19] : memref<128x128xf32, #tpu.memory_space<vmem>>, vector<128x128xf32>
    %cst_20 = arith.constant dense<0.000000e+00> : vector<16x128xf32>
    %32 = tpu.matmul %30, %31, %cst_20 {dimension_numbers = #tpu.dot_dimension_numbers<[1], [0], [0], [1], [0, 0, 1, 1], [], []>} : vector<16x128xf32>, vector<128x128xf32>, vector<16x128xf32> -> vector<16x128xf32>
    %cst_21 = arith.constant dense<0.000000e+00> : vector<16x128xf32>
    %33 = tpu.matmul %1, %32, %cst_21 {dimension_numbers = #tpu.dot_dimension_numbers<[1], [0], [0], [1], [0, 0, 1, 1], [], []>} : vector<16x16xf32>, vector<16x128xf32>, vector<16x128xf32> -> vector<16x128xf32>
    %c0_22 = arith.constant 0 : index
    %c0_23 = arith.constant 0 : index
    %34 = vector.load %arg8[%c0_22, %c0_23] : memref<1x128xf32, #tpu.memory_space<vmem>>, vector<1x128xf32>
    %c0_24 = arith.constant 0 : index
    %c0_25 = arith.constant 0 : index
    %35 = vector.load %arg9[%c0_24, %c0_25] : memref<1x128xf32, #tpu.memory_space<vmem>>, vector<1x128xf32>
    %cst_26 = arith.constant dense<0.000000e+00> : vector<128xf32>
    %36 = vector.multi_reduction <add>, %33, %cst_26 [0] : vector<16x128xf32> to vector<128xf32>
    %37 = vector.shape_cast %36 : vector<128xf32> to vector<1x128xf32>
    %cst_27 = arith.constant 6.250000e-02 : f32
    %38 = vector.broadcast %cst_27 : f32 to vector<1x128xf32>
    %39 = arith.mulf %37, %38 : vector<1x128xf32>
    %40 = vector.broadcast %39 : vector<1x128xf32> to vector<16x128xf32>
    %41 = arith.subf %33, %40 : vector<16x128xf32>
    %42 = arith.mulf %41, %41 : vector<16x128xf32>
    %cst_28 = arith.constant dense<0.000000e+00> : vector<128xf32>
    %43 = vector.multi_reduction <add>, %42, %cst_28 [0] : vector<16x128xf32> to vector<128xf32>
    %44 = vector.shape_cast %43 : vector<128xf32> to vector<1x128xf32>
    %cst_29 = arith.constant 6.250000e-02 : f32
    %45 = vector.broadcast %cst_29 : f32 to vector<1x128xf32>
    %46 = arith.mulf %44, %45 : vector<1x128xf32>
    %cst_30 = arith.constant 9.99999974E-6 : f32
    %47 = vector.broadcast %cst_30 : f32 to vector<1x128xf32>
    %48 = arith.addf %46, %47 : vector<1x128xf32>
    %49 = math.rsqrt %48 : vector<1x128xf32>
    %50 = arith.mulf %34, %49 : vector<1x128xf32>
    %51 = vector.broadcast %50 : vector<1x128xf32> to vector<16x128xf32>
    %52 = arith.mulf %41, %51 : vector<16x128xf32>
    %53 = vector.broadcast %35 : vector<1x128xf32> to vector<16x128xf32>
    %54 = arith.addf %52, %53 : vector<16x128xf32>
    %cst_31 = arith.constant 0.00999999977 : f32
    %55 = vector.broadcast %cst_31 : f32 to vector<16x128xf32>
    %56 = arith.mulf %55, %54 : vector<16x128xf32>
    %57 = arith.maximumf %54, %56 : vector<16x128xf32>
    %c0_32 = arith.constant 0 : index
    %c0_33 = arith.constant 0 : index
    %58 = vector.load %arg5[%c0_32, %c0_33] : memref<128x128xf32, #tpu.memory_space<vmem>>, vector<128x128xf32>
    %cst_34 = arith.constant dense<0.000000e+00> : vector<16x128xf32>
    %59 = tpu.matmul %57, %58, %cst_34 {dimension_numbers = #tpu.dot_dimension_numbers<[1], [0], [0], [1], [0, 0, 1, 1], [], []>} : vector<16x128xf32>, vector<128x128xf32>, vector<16x128xf32> -> vector<16x128xf32>
    %cst_35 = arith.constant dense<0.000000e+00> : vector<16x128xf32>
    %60 = tpu.matmul %1, %59, %cst_35 {dimension_numbers = #tpu.dot_dimension_numbers<[1], [0], [0], [1], [0, 0, 1, 1], [], []>} : vector<16x16xf32>, vector<16x128xf32>, vector<16x128xf32> -> vector<16x128xf32>
    %c0_36 = arith.constant 0 : index
    %c0_37 = arith.constant 0 : index
    %c0_38 = arith.constant 0 : index
    %61 = vector.load %arg10[%c0_36, %c0_37, %c0_38] : memref<1x16x128xf32, #tpu.memory_space<vmem>>, vector<1x16x128xf32>
    %62 = vector.shape_cast %61 : vector<1x16x128xf32> to vector<16x128xf32>
    %63 = vector.shape_cast %60 : vector<16x128xf32> to vector<1x16x128xf32>
    tpu.vector_store %arg10[%c0_36, %c0_37, %c0_38], %63 {strides = array<i32>} : memref<1x16x128xf32, #tpu.memory_space<vmem>>, vector<1x16x128xf32>,
    return
  }
  func.func @transform_0(%arg0: i32) -> (i32, i32, i32) {
    %c0_i32 = arith.constant 0 : i32
    %c0_i32_0 = arith.constant 0 : i32
    %c0_i32_1 = arith.constant 0 : i32
    return %arg0, %c0_i32, %c0_i32_0 : i32, i32, i32
  }
  func.func @transform_1(%arg0: i32) -> (i32, i32, i32) {
    %c0_i32 = arith.constant 0 : i32
    %c0_i32_0 = arith.constant 0 : i32
    %c0_i32_1 = arith.constant 0 : i32
    return %arg0, %c0_i32, %c0_i32_0 : i32, i32, i32
  }
  func.func @transform_2(%arg0: i32) -> (i32, i32) {
    %c0_i32 = arith.constant 0 : i32
    %c0_i32_0 = arith.constant 0 : i32
    %c0_i32_1 = arith.constant 0 : i32
    return %c0_i32, %c0_i32_0 : i32, i32
  }
  func.func @transform_3(%arg0: i32) -> (i32, i32) {
    %c0_i32 = arith.constant 0 : i32
    %c0_i32_0 = arith.constant 0 : i32
    %c0_i32_1 = arith.constant 0 : i32
    return %c0_i32, %c0_i32_0 : i32, i32
  }
  func.func @transform_4(%arg0: i32) -> (i32, i32) {
    %c0_i32 = arith.constant 0 : i32
    %c0_i32_0 = arith.constant 0 : i32
    %c0_i32_1 = arith.constant 0 : i32
    return %c0_i32, %c0_i32_0 : i32, i32
  }
  func.func @transform_5(%arg0: i32) -> (i32, i32) {
    %c0_i32 = arith.constant 0 : i32
    %c0_i32_0 = arith.constant 0 : i32
    %c0_i32_1 = arith.constant 0 : i32
    return %c0_i32, %c0_i32_0 : i32, i32
  }
  func.func @transform_6(%arg0: i32) -> (i32, i32) {
    %c0_i32 = arith.constant 0 : i32
    %c0_i32_0 = arith.constant 0 : i32
    %c0_i32_1 = arith.constant 0 : i32
    return %c0_i32, %c0_i32_0 : i32, i32
  }
  func.func @transform_7(%arg0: i32) -> (i32, i32) {
    %c0_i32 = arith.constant 0 : i32
    %c0_i32_0 = arith.constant 0 : i32
    %c0_i32_1 = arith.constant 0 : i32
    return %c0_i32, %c0_i32_0 : i32, i32
  }
  func.func @transform_8(%arg0: i32) -> (i32, i32) {
    %c0_i32 = arith.constant 0 : i32
    %c0_i32_0 = arith.constant 0 : i32
    %c0_i32_1 = arith.constant 0 : i32
    return %c0_i32, %c0_i32_0 : i32, i32
  }
  func.func @transform_9(%arg0: i32) -> (i32, i32, i32) {
    %c0_i32 = arith.constant 0 : i32
    %c0_i32_0 = arith.constant 0 : i32
    %c0_i32_1 = arith.constant 0 : i32
    return %arg0, %c0_i32, %c0_i32_0 : i32, i32, i32
  }
}

</mosaic_0001>

<bundles_post_ra>
// kernel: gcn_forward.1
= control target key start
LH: loop header
LB: loop body
LE: loop exit
PB: predicated region body
PF: predicated region fallthrough
CT: control target
= control target key end

     0   :  { %s1921_s0 = inlined_call_operand.hbm [shape: f32[4,16,144], index: 0, kind: input, shape index: {}]   ;;  %s1922_s1 = inlined_call_operand.hbm [shape: f32[4,16,16], index: 1, kind: input, shape index: {}]   ;;  %s1923_s2 = inlined_call_operand.hbm [shape: f32[144,128], index: 2, kind: input, shape index: {}]   ;;  %s1924_s3 = inlined_call_operand.hbm [shape: f32[128,128], index: 3, kind: input, shape index: {}]   ;;  %s1925_s4 = inlined_call_operand.hbm [shape: f32[128,128], index: 4, kind: input, shape index: {}]   ;;  %s1926_s5 = inlined_call_operand.vmem [shape: f32[1,128], index: 5, kind: input, shape index: {}]   ;;  %s1927_s6 = inlined_call_operand.vmem [shape: f32[1,128], index: 6, kind: input, shape index: {}]   ;;  %s1928_s7 = inlined_call_operand.vmem [shape: f32[1,128], index: 7, kind: input, shape index: {}]   ;;  %s1929_s8 = inlined_call_operand.vmem [shape: f32[1,128], index: 8, kind: input, shape index: {}]   ;;  %s1930_s9 = inlined_call_operand.vmem [shape: f32[4,16,128], index: 9, kind: output, shape index: {}]  }
   0x1   :  { %1935 = sst [smem:[#allocation14_spill]] %s1921_s0 }
   0x2   :  { %1936 = sst [smem:[#allocation15_spill]] %s1923_s2 }
   0x3   :  { %1937 = sst [smem:[#allocation16_spill]] %s1924_s3 }
   0x4   :  { %1938 = sst [smem:[#allocation17_spill]] %s1925_s4 }
   0x5   :  { %14 = vsyncpa [#allocation3], 0 }
   0x6   :  { %16 = vsyncpa [#allocation3 + $0x1], 0 }
   0x7   :  { %17 = vsyncpa [#allocation5], 0 }
   0x8   :  { %19 = vsyncpa [#allocation5 + $0x1], 0 }
   0x9   :  { %20 = vsyncpa [#allocation8], 0  ;;  %s1665_s30 = smov 0   ;;  %s1667_s10 = smov 0  }
   0xa   :  { %s1669_s11 = smov 0   ;;  %s1671_s12 = smov 0  }
   0xb LB: > { %s1684_s13 = sadd.s32 4294967295, %s1603_s12   ;;  %p46_p0 = scmp.ne.s32.totalorder %s1595_s10, %s1591_s30  ;;  %s1603_s12 = sphi %s1671_s12, %s1958_s12   ;;  %s1599_s11 = sphi %s1669_s11, %s1957_s11   ;;  %s1595_s10 = sphi %s1667_s10, %s1956_s10   ;;  %s1591_s30 = sphi %s1665_s30, %s1955_s30  }
   0xc   : > { %p1933_p1 = scmp.eq.s32.totalorder %s1684_s13, 0  ;;  %p1166_p2 = scmp.ge.s32.totalorder %s1603_s12, 1 }
   0xd   : > { %p256_p3 = scmp.lt.s32.totalorder %s1603_s12, 5  ;;  %s1605_s16 = smov [#allocation6]  }
   0xe   : > { %p1692_p4 = por %p1933_p1, %p46_p0  ;;  %s268_s17 = sshll.u32 %s1605_s16, 4  ;;  %s269_s17 = int_to_ptr.vmem [resolvable:$true] %s268_s17 }
   0xf   : > { %p1696_p5 = pnand %p1166_p2, %p256_p3  ;;  %s1606_s19 = smov [#allocation7]  }
  0x10   : > { %s1939_s14 = scalar_select %p1692_p4, 1, 0 }
  0x11   : > { %p1355_p6 = pneg %p1696_p5  ;;  %s281_s20 = sshll.u32 %s1606_s19, 4  ;;  %s282_s20 = int_to_ptr.vmem [resolvable:$true] %s281_s20 }
  0x12   : > { %s1607_s21 = smov [#allocation9]   ;;  %s1434_s23 = scalar_lea.vmem %s269_s17, 2304 }
  0x13   : > { %p1704_p7 = pnand %p1355_p6, %p1933_p1  ;;  %s294_s22 = sshll.u32 %s1607_s21, 4  ;;  %s295_s22 = int_to_ptr.vmem [resolvable:$true] %s294_s22 }
  0x14   : > { %p1435_p9 = scmp.ne.s32.totalorder %s269_s17, %s1434_s23  ;;  %p1442_p12 = scmp.lt.s32.totalorder %s269_s17, %s269_s17 }
  0x15   : > { %p1425_p8 = pneg %p1704_p7  ;;  %p1443_p13 = scmp.lt.s32.totalorder %s1434_s23, %s1434_s23 }
  0x17   : > { %p1437_p10 = pnand %p1435_p9, %p1425_p8  ;;  %p1444_p0 = por %p1443_p13, %p1442_p12 }
  0x19   : > { %p1438_p11 = pneg %p1437_p10 }
  0x1b   : > { %p1445_p2 = pnand %p1444_p0, %p1438_p11 }
  0x1d   : > { %1448 = shalt.err (!%p1445_p2)
}
  0x1e   : > { %s1931_s24 = smov 128   ;;  %s1932_s25 = smov 8  }
  0x1f   : > { %s1942_s2 = sld [smem:[#allocation15_spill]]  ;;  %s1460_s28 = scalar_lea.vmem %s282_s20, 2048 }
  0x20   : > { %p1461_p3 = scmp.ne.s32.totalorder %s282_s20, %s1460_s28  ;;  %p1468_p10 = scmp.lt.s32.totalorder %s282_s20, %s282_s20 }
  0x21   : > { %p1469_p11 = scmp.lt.s32.totalorder %s1460_s28, %s1460_s28 }
  0x22   : > { %p1463_p6 = pnand %p1461_p3, %p1425_p8 }
  0x23   : > { %p1470_p12 = por %p1469_p11, %p1468_p10 }
  0x24   : > { %p1464_p9 = pneg %p1463_p6 }
  0x25   : > { %1358 = dma.hbm_to_vmem [thread:$0]  (!%p1704_p7), %s1942_s2, 2304, %s269_s17, [#allocation5], %s1931_s24, %s1931_s24, %s1932_s25  }
  0x26   : > { %p1471_p13 = pnand %p1470_p12, %p1464_p9 }
  0x28   : > { %1474 = shalt.err (!%p1471_p13)
}
  0x29   : > { %s1943_s3 = sld [smem:[#allocation16_spill]]  ;;  %s1486_s16 = scalar_lea.vmem %s295_s22, 2048 }
  0x2a   : > { %p1487_p0 = scmp.ne.s32.totalorder %s295_s22, %s1486_s16  ;;  %p1494_p6 = scmp.lt.s32.totalorder %s295_s22, %s295_s22 }
  0x2b   : > { %p1495_p9 = scmp.lt.s32.totalorder %s1486_s16, %s1486_s16 }
  0x2c   : > { %p1489_p2 = pnand %p1487_p0, %p1425_p8 }
  0x2d   : > { %p1496_p10 = por %p1495_p9, %p1494_p6 }
  0x2e   : > { %p1490_p3 = pneg %p1489_p2 }
  0x2f   : > { %1361 = dma.hbm_to_vmem [thread:$0]  (!%p1704_p7), %s1943_s3, 2048, %s282_s20, [#allocation8], %s1931_s24, %s1931_s24, %s1932_s25  }
  0x30   : > { %p1497_p11 = pnand %p1496_p10, %p1490_p3 }
  0x32   : > { %1500 = shalt.err (!%p1497_p11)
}
  0x33   : > { %s1944_s4 = sld [smem:[#allocation17_spill]]  ;;  %s1744_s20 = sadd.s32 1, %s1603_s12  }
  0x34   : > { %s30_s18 = ssub.s32 %s1603_s12, %s1744_s20  ;;  %s33_s21 = sadd.s32 1, %s1599_s11 }
  0x35   : > { %p31_p8 = scmp.eq.s32.totalorder %s30_s18, 0  ;;  %p40_p12 = scmp.ne.s32.totalorder %s1599_s11, %s1595_s10 }
  0x36   : > { %p41_p13 = scmp.eq.s32.totalorder %s1603_s12, 0  ;;  %p1375_p0 = scmp.lt.s32.totalorder %s1603_s12, 4 }
  0x37   : > { %s1754_s23 = scalar_select %p31_p8, %s1599_s11, %s33_s21  }
  0x38   : > { %p42_p2 = por %p41_p13, %p40_p12  ;;  %s1757_s26 = sand.u32 1, %s1599_s11  }
  0x39   : > { %1364 = dma.hbm_to_vmem [thread:$0]  (!%p1704_p7), %s1944_s4, 2048, %s295_s22, [#allocation8], %s1931_s24, %s1931_s24, %s1932_s25  }
  0x3a   : > { %s1171_s27 = sshll.u32 %s1757_s26, 5  ;;  %s1197_s28 = sshll.u32 %s1603_s12, 9 }
  0x3b   : > { %s1945_s0 = sld [smem:[#allocation14_spill]]  ;;  %s324_s16 = scalar_lea.vmem [#allocation2], %s1171_s27 }
  0x3c   : > { %s331_s17 = sshll.u32 %s324_s16, 4  ;;  %p1768_p7 = pnand %p1375_p0, %p42_p2  ;;  %s1766_s17 = int_to_ptr.vmem [resolvable:$true] %s331_s17 }
  0x3d   : > { %s321_s21 = scalar_lea.sflag [#allocation3], %s1757_s26 }
  0x3e   : > { %p1503_p6 = pneg %p1768_p7 }
  0x41   : > { %s1764_s30 = scalar_lea.hbm %s1945_s0, %s1197_s28  ;;  %s1506_s22 = scalar_lea.hbm %s1945_s0, 2048 }
  0x42   : > { %s1501_s24 = scalar_lea.hbm %s1764_s30, 512  ;;  %p1507_p11 = scmp.lt.s32.totalorder %s1764_s30, %s1945_s0 }
  0x43   : > { %p1502_p3 = scmp.ne.s32.totalorder %s1764_s30, %s1501_s24  ;;  %p1508_p8 = scmp.lt.s32.totalorder %s1506_s22, %s1501_s24 }
  0x45   : > { %p1504_p9 = pnand %p1503_p6, %p1502_p3  ;;  %p1509_p12 = por %p1508_p8, %p1507_p11 }
  0x47   : > { %p1505_p10 = pneg %p1504_p9 }
  0x49   : > { %p1510_p13 = pnand %p1509_p12, %p1505_p10 }
  0x4b   : > { %1513 = shalt.err (!%p1510_p13)
}
  0x4c   : > { %s1514_s25 = scalar_lea.vmem %s1766_s17, 512  ;;  %s1610_s27 = smov [#allocation2]  }
  0x4d   : > { %p1515_p0 = scmp.ne.s32.totalorder %s1766_s17, %s1514_s25  ;;  %s1519_s28 = sshll.u32 %s1610_s27, 4  ;;  %s1520_s28 = int_to_ptr.vmem [resolvable:$false] %s1519_s28 }
  0x4e   : > { %s1521_s18 = scalar_lea.vmem %s1520_s28, 1024  ;;  %p1522_p9 = scmp.lt.s32.totalorder %s1766_s17, %s1520_s28 }
  0x4f   : > { %p1517_p2 = pnand %p1515_p0, %p1503_p6  ;;  %p1523_p1 = scmp.lt.s32.totalorder %s1521_s18, %s1514_s25 }
  0x51   : > { %p1518_p3 = pneg %p1517_p2  ;;  %p1524_p4 = por %p1523_p1, %p1522_p9 }
  0x53   : > { %p1525_p11 = pnand %p1524_p4, %p1518_p3 }
  0x55   : > { %1528 = shalt.err (!%p1525_p11)
}
  0x56   : > { %s1611_s24 = smov 256   ;;  %s1612_s22 = smov 16  }
  0x57   : > { %1368 = dma.hbm_to_vmem [thread:$0]  (!%p1768_p7), %s1764_s30, 512, %s1766_s17, %s321_s21, %s1611_s24, %s1611_s24, %s1612_s22  }
  0x58   : > { %s1174_s29 = sshll.u32 %s1757_s26, 4  ;;  %s1198_s16 = sshll.u32 %s1603_s12, 8 }
  0x59   : > { %s1805_s18 = scalar_lea.hbm %s1922_s1, %s1198_s16  ;;  %s345_s28 = scalar_lea.vmem [#allocation4], %s1174_s29 }
  0x5a   : > { %s352_s0 = sshll.u32 %s345_s28, 4  ;;  %s1947_s2 = sand.u32 1, %s1603_s12   ;;  %s1807_s0 = int_to_ptr.vmem [resolvable:$true] %s352_s0 }
  0x5b   : > { %s342_s3 = scalar_lea.sflag [#allocation5], %s1947_s2  ;;  %s1529_s4 = scalar_lea.hbm %s1805_s18, 256 }
  0x5c   : > { %p1530_p1 = scmp.ne.s32.totalorder %s1805_s18, %s1529_s4  ;;  %s1534_s17 = scalar_lea.hbm %s1922_s1, 1024 }
  0x5d   : > { %p1535_p8 = scmp.lt.s32.totalorder %s1805_s18, %s1922_s1  ;;  %p1536_p12 = scmp.lt.s32.totalorder %s1534_s17, %s1529_s4 }
  0x5e   : > { %p1532_p4 = pnand %p1530_p1, %p1503_p6 }
  0x5f   : > { %p1537_p13 = por %p1536_p12, %p1535_p8 }
  0x60   : > { %p1533_p10 = pneg %p1532_p4 }
  0x62   : > { %p1538_p0 = pnand %p1537_p13, %p1533_p10 }
  0x64   : > { %1541 = shalt.err (!%p1538_p0)
}
  0x65   : > { %s1542_s2 = scalar_lea.vmem %s1807_s0, 256  ;;  %s1613_s12 = smov [#allocation4]  }
  0x66   : > { %p1543_p2 = scmp.ne.s32.totalorder %s1807_s0, %s1542_s2  ;;  %s1547_s22 = sshll.u32 %s1613_s12, 4  ;;  %s1548_s22 = int_to_ptr.vmem [resolvable:$false] %s1547_s22 }
  0x67   : > { %s1549_s29 = scalar_lea.vmem %s1548_s22, 512  ;;  %p1550_p11 = scmp.lt.s32.totalorder %s1807_s0, %s1548_s22 }
  0x68   : > { %p1545_p3 = pnand %p1543_p2, %p1503_p6  ;;  %p1551_p1 = scmp.lt.s32.totalorder %s1549_s29, %s1542_s2 }
  0x6a   : > { %p1546_p9 = pneg %p1545_p3  ;;  %p1552_p4 = por %p1551_p1, %p1550_p11 }
  0x6c   : > { %p1553_p8 = pnand %p1552_p4, %p1546_p9 }
  0x6e   : > { %1556 = shalt.err (!%p1553_p8)
}
  0x6f   : > { %s1948_s4 = smov 8   ;;  %s1949_s16 = smov 128  }
  0x70   : > { %1371 = dma.hbm_to_vmem [thread:$0]  (!%p1768_p7), %s1805_s18, 256, %s1807_s0, %s342_s3, %s1949_s16, %s1949_s16, %s1948_s4  }
  0x71   : > { %364 = sbr.rel (%p1696_p5) target bundleno = 1476 (0x5c4), region = 56  ;;  %s366_s27 = sand.u32 (!%p1696_p5), 1, %s1595_s10  }
  0x72   : > { %s1178_s25 = sshll.u32 (!%p1696_p5), %s366_s27, 5  ;;  %s367_s28 = scalar_lea.sflag (!%p1696_p5), [#allocation3], %s366_s27 }
  0x73   : > { %s1839_s26 = scalar_lea.vmem (!%p1696_p5), [#allocation2], %s1178_s25  ;;  %p1950_p6 = scmp.ne.s32.totalorder (!%p1696_p5), %s1939_s14, 0 }
  0x76   : > { %1574 = dma.done.wait (%p1950_p6), %s367_s28, 512  }
  0x77   : > { %1576 = vsyncadd (%p1950_p6), %s367_s28, 4294966784  ;;  %s375_s19 = sand.u32 1, %s1684_s13   ;;  %s1179_s30 = sshll.u32 %s366_s27, 4 }
  0x78   : > { %s376_s0 = scalar_lea.sflag [#allocation5], %s375_s19  ;;  %s1846_s3 = scalar_lea.vmem [#allocation4], %s1179_s30 }
  0x79   : > { %1578 = dma.done.wait (%p1950_p6), %s376_s0, 256  }
  0x7a   : > { %1580 = vsyncadd (%p1950_p6), %s376_s0, 4294967040  ;;  %p1951_p5 = scmp.eq.s32.totalorder %s1684_s13, 0 }
  0x7c   : > { %1582 = dma.done.wait (%p1951_p5), [#allocation5], 2304   ;;  %p1952_p7 = pmov %p1951_p5 }
  0x7d   : > { %p1953_p10 = pmov %p1951_p5 }
  0x7e   : > { %1584 = vsyncadd (%p1952_p7), [#allocation5], 4294964992 }
  0x7f   : > { %1586 = dma.done.wait (%p1953_p10), [#allocation8], 4096   ;;  %p1954_p12 = pmov %p1951_p5 }
  0x80   : > { %v1614_v0 = vmov 0.0   ;;  %v457_v1 = vld [vmem:[#allocation6 + $0x78] sm:$0xff]  ;;  %v456_v2 = vld [vmem:[#allocation6 + $0x70] sm:$0xff]  ;;  %v455_v3 = vld [vmem:[#allocation6 + $0x68] sm:$0xff]  ;;  %vm460_vm0 = vcmask 130048   ;;  %p431_p13 = scmp.lt.s32.totalorder %s1684_s13, 3 }
  0x81   : > { %1588 = vsyncadd (%p1954_p12), [#allocation8], 4294963200  ;;  %467 = vmatprep.subr.mxu0 %v1614_v0  ;;  %v454_v4 = vld [vmem:[#allocation6 + $0x60] sm:$0xff]  ;;  %v453_v5 = vld [vmem:[#allocation6 + $0x58] sm:$0xff] }
  0x82   : > { %468 = vmatpush1.msra.mxu0 %v457_v1  ;;  %v439_v6 = vld [vmem:[%s1839_s26 + $0x8] sm:$0xff]  ;;  %v452_v7 = vld [vmem:[#allocation6 + $0x50] sm:$0xff]  ;;  %v450_v9 = vld [vmem:[#allocation6 + $0x40] sm:$0xff]  ;;  %s1960_s13 = smov (!%p431_p13, %s1684_s13), 3 }
  0x83   : > { %469 = vmatprep.subr.mxu0 %v1614_v0  ;;  %1185 = vmatprep.mubr.msk.f32.mxu0 %vm460_vm0, %v439_v6  ;;  %v451_v8 = vld [vmem:[#allocation6 + $0x48] sm:$0xff]  ;;  %v449_v10 = vld [vmem:[#allocation6 + $0x38] sm:$0xff]  ;;  %v448_v11 = vld [vmem:[#allocation6 + $0x30] sm:$0xff]  ;;  %s1199_s22 = sshll.u32 %s1960_s13, 4 }
  0x84   : > { %470 = vmatpush1.msra.mxu0 %v456_v2  ;;  %v447_v12 = vld [vmem:[#allocation6 + $0x28] sm:$0xff]  ;;  %v446_v13 = vld [vmem:[#allocation6 + $0x20] sm:$0xff]  ;;  %v445_v14 = vld [vmem:[#allocation6 + $0x18] sm:$0xff]  ;;  %s435_s16 = scalar_lea.vmem %s1930_s9, %s1199_s22 }
  0x85   : > { %471 = vmatprep.subr.mxu0 %v1614_v0  ;;  %v444_v15 = vld [vmem:[#allocation6 + $0x10] sm:$0xff]  ;;  %v443_v16 = vld [vmem:[#allocation6 + $0x8] sm:$0xff]  ;;  %v442_v17 = vld [vmem:[#allocation6] sm:$0xff] }
  0x86   : > { %472 = vmatpush1.msra.mxu0 %v455_v3  ;;  %v459_v18 = vld [vmem:[#allocation6 + $0x88] sm:$0xff]  ;;  %v458_v19 = vld [vmem:[#allocation6 + $0x80] sm:$0xff]  ;;  %v441_v21 = vld [vmem:[%s1839_s26 + $0x18] sm:$0xff] }
  0x87   : > { %473 = vmatprep.subr.mxu0 %v1614_v0  ;;  %v438_v20 = vld [vmem:[%s1839_s26] sm:$0xff]  ;;  %v440_v22 = vld [vmem:[%s1839_s26 + $0x10] sm:$0xff]  ;;  %v1872_v28 = vld [vmem:[%s1846_s3 + $0x8] sm:$0xff] }
  0x88   : > { %474 = vmatpush1.msra.mxu0 %v454_v4  ;;  %v1867_v23 = vld [vmem:[%s1846_s3] sm:$0xff]  ;;  %v683_v29 = vld [vmem:[#allocation7 + $0x78] sm:$0xff]  ;;  %v681_v31 = vld [vmem:[#allocation7 + $0x68] sm:$0xff]  ;;  %v649_v4 = vlaneseq }
  0x89   : > { %475 = vmatprep.subr.mxu0 %v1614_v0  ;;  %1252 = vmatprep.mubr.msk.f32.mxu1 %vm460_vm0, %v1867_v23  ;;  %v682_v30 = vld [vmem:[#allocation7 + $0x70] sm:$0xff]  ;;  %v680_v32 = vld [vmem:[#allocation7 + $0x60] sm:$0xff]  ;;  %v679_v33 = vld [vmem:[#allocation7 + $0x58] sm:$0xff] }
  0x8a   : > { %476 = vmatpush1.msra.mxu0 %v453_v5  ;;  %v678_v34 = vld [vmem:[#allocation7 + $0x50] sm:$0xff]  ;;  %v677_v35 = vld [vmem:[#allocation7 + $0x48] sm:$0xff]  ;;  %v676_v36 = vld [vmem:[#allocation7 + $0x40] sm:$0xff]  ;;  %v1876_v5 = vshrl.u32 %v649_v4, 7 }
  0x8b   : > { %477 = vmatprep.subr.mxu0 %v1614_v0  ;;  %v675_v37 = vld [vmem:[#allocation7 + $0x38] sm:$0xff]  ;;  %v674_v38 = vld [vmem:[#allocation7 + $0x30] sm:$0xff]  ;;  %v673_v39 = vld [vmem:[#allocation7 + $0x28] sm:$0xff] }
  0x8c   : > { %478 = vmatpush1.msra.mxu0 %v452_v7  ;;  %v672_v40 = vld [vmem:[#allocation7 + $0x20] sm:$0xff]  ;;  %v671_v41 = vld [vmem:[#allocation7 + $0x18] sm:$0xff]  ;;  %v670_v42 = vld [vmem:[#allocation7 + $0x10] sm:$0xff]  ;;  %v651_v7 = vsub.s32 0, %v1876_v5 }
  0x8d   : > { %479 = vmatprep.subr.mxu0 %v1614_v0  ;;  %v669_v43 = vld [vmem:[#allocation7 + $0x8] sm:$0xff]  ;;  %v668_v44 = vld [vmem:[#allocation7] sm:$0xff]  ;;  %v623_v6 = vld [vmem:[%s1926_s5] sm:$0x1] }
  0x8e   : > { %480 = vmatpush1.msra.mxu0 %v451_v8 }
  0x8f   : > { %481 = vmatprep.subr.mxu0 %v1614_v0 }
  0x90   : > { %482 = vmatpush1.msra.mxu0 %v450_v9 }
  0x91   : > { %483 = vmatprep.subr.mxu0 %v1614_v0 }
  0x92   : > { %484 = vmatpush1.msra.mxu0 %v449_v10 }
  0x93   : > { %485 = vmatprep.subr.mxu0 %v1614_v0 }
  0x94   : > { %486 = vmatpush1.msra.mxu0 %v448_v11  ;;  %v1189_v11 = vld [vmem:[%s1927_s6] ss:$0 sm:$0xff] }
  0x95   : > { %487 = vmatprep.subr.mxu0 %v1614_v0 }
  0x96   : > { %488 = vmatpush1.msra.mxu0 %v447_v12 }
  0x97   : > { %489 = vmatprep.subr.mxu0 %v1614_v0 }
  0x98   : > { %490 = vmatpush1.msra.mxu0 %v446_v13 }
  0x99   : > { %491 = vmatprep.subr.mxu0 %v1614_v0 }
  0x9a   : > { %492 = vmatpush1.msra.mxu0 %v445_v14 }
  0x9b   : > { %493 = vmatprep.subr.mxu0 %v1614_v0 }
  0x9c   : > { %494 = vmatpush1.msra.mxu0 %v444_v15 }
  0x9d   : > { %495 = vmatprep.subr.mxu0 %v1614_v0 }
  0x9e   : > { %496 = vmatpush1.msra.mxu0 %v443_v16 }
  0x9f   : > { %497 = vmatprep.subr.mxu0 %v1614_v0 }
  0xa0   : > { %498 = vmatpush1.msra.mxu0 %v442_v17 }
  0xa1   : > { %527 = vmatprep.subr.mxu0 %v1614_v0 }
  0xa2   : > { %528 = vmatpush2.msra.mxu0 %v459_v18 }
  0xa3   : > { %529 = vmatprep.subr.mxu0 %v1614_v0 }
  0xa4   : > { %530 = vmatpush2.msra.mxu0 %v458_v19 }
  0xa5   : > { %532 = vmatmul.mubr.f32.vlgmr.msra.gmra.mxu0 %v438_v20 }
  0xa6   : > { %1186 = vmatprep.mubr.msk.f32.mxu0 %vm460_vm0, %v441_v21 }
  0xa9   : > { %537 = vmatmul.mubr.f32.gmra.mxu0 %v440_v22  ;;  %v894_v22 = vld [vmem:[#allocation9 + $0x78] sm:$0xff] }
  0xaa   : > { %1297 = vmatprep.subr.mxu0 %v894_v22 }
  0xab   : > { %1298 = vmatpush3.msra.mxu0 %v894_v22 }
 0x165   : > { %v533_v24 = vpop.f32.mrf.mxu0 }
 0x167   : > { %v535_v25 = vpop.f32.mrf.mxu0 }
 0x168   : > { %v892_v25 = vld [vmem:[#allocation9 + $0x68] sm:$0xff] }
 0x169   : > { %v538_v26 = vpop.f32.mrf.mxu0 }
 0x16a   : > { %1248 = vmatprep.subr.mxu1 %v538_v26 }
 0x16b   : > { %v540_v27 = vpop.f32.mrf.mxu0  ;;  %1249 = vmatpush3.msra.mxu1 %v538_v26  ;;  %v891_v26 = vld [vmem:[#allocation9 + $0x60] sm:$0xff] }
 0x16c   : > { %1250 = vmatprep.subr.mxu1 %v533_v24  ;;  %v890_v27 = vld [vmem:[#allocation9 + $0x58] sm:$0xff] }
 0x16d   : > { %1251 = vmatpush3.msra.mxu1 %v533_v24  ;;  %v893_v24 = vld [vmem:[#allocation9 + $0x70] sm:$0xff] }
 0x16e   : > { %1253 = vmatmul.mubr.msk.f32.vlgmr.msra.gmra.mxu1 %vm460_vm0, %v1872_v28  ;;  %1255 = vmatprep.subr.mxu1 %v683_v29 }
 0x16f   : > { %1256 = vmatpush3.msra.mxu1 %v683_v29  ;;  %1299 = vmatprep.subr.mxu0 %v893_v24  ;;  %v889_v29 = vld [vmem:[#allocation9 + $0x50] sm:$0xff] }
 0x170   : > { %1257 = vmatprep.subr.mxu1 %v682_v30  ;;  %1300 = vmatpush3.msra.mxu0 %v893_v24 }
 0x171   : > { %1258 = vmatpush3.msra.mxu1 %v682_v30  ;;  %1301 = vmatprep.subr.mxu0 %v892_v25  ;;  %v888_v30 = vld [vmem:[#allocation9 + $0x48] sm:$0xff] }
 0x172   : > { %1259 = vmatprep.subr.mxu1 %v681_v31  ;;  %1302 = vmatpush3.msra.mxu0 %v892_v25 }
 0x173   : > { %1260 = vmatpush3.msra.mxu1 %v681_v31  ;;  %1303 = vmatprep.subr.mxu0 %v891_v26  ;;  %v886_v31 = vld [vmem:[#allocation9 + $0x38] sm:$0xff] }
 0x174   : > { %1261 = vmatprep.subr.mxu1 %v680_v32  ;;  %1304 = vmatpush3.msra.mxu0 %v891_v26 }
 0x175   : > { %1262 = vmatpush3.msra.mxu1 %v680_v32  ;;  %1305 = vmatprep.subr.mxu0 %v890_v27  ;;  %v885_v32 = vld [vmem:[#allocation9 + $0x30] sm:$0xff] }
 0x176   : > { %1263 = vmatprep.subr.mxu1 %v679_v33  ;;  %1306 = vmatpush3.msra.mxu0 %v890_v27 }
 0x177   : > { %1264 = vmatpush3.msra.mxu1 %v679_v33  ;;  %1307 = vmatprep.subr.mxu0 %v889_v29  ;;  %v884_v33 = vld [vmem:[#allocation9 + $0x28] sm:$0xff] }
 0x178   : > { %1265 = vmatprep.subr.mxu1 %v678_v34  ;;  %1308 = vmatpush3.msra.mxu0 %v889_v29 }
 0x179   : > { %1266 = vmatpush3.msra.mxu1 %v678_v34  ;;  %1309 = vmatprep.subr.mxu0 %v888_v30  ;;  %v883_v34 = vld [vmem:[#allocation9 + $0x20] sm:$0xff] }
 0x17a   : > { %1267 = vmatprep.subr.mxu1 %v677_v35  ;;  %1310 = vmatpush3.msra.mxu0 %v888_v30 }
 0x17b   : > { %1268 = vmatpush3.msra.mxu1 %v677_v35  ;;  %v882_v35 = vld [vmem:[#allocation9 + $0x18] sm:$0xff] }
 0x17c   : > { %1269 = vmatprep.subr.mxu1 %v676_v36 }
 0x17d   : > { %1270 = vmatpush3.msra.mxu1 %v676_v36  ;;  %v881_v36 = vld [vmem:[#allocation9 + $0x10] sm:$0xff] }
 0x17e   : > { %1271 = vmatprep.subr.mxu1 %v675_v37 }
 0x17f   : > { %1272 = vmatpush3.msra.mxu1 %v675_v37  ;;  %v880_v37 = vld [vmem:[#allocation9 + $0x8] sm:$0xff] }
 0x180   : > { %1273 = vmatprep.subr.mxu1 %v674_v38 }
 0x181   : > { %1274 = vmatpush3.msra.mxu1 %v674_v38  ;;  %v879_v38 = vld [vmem:[#allocation9] sm:$0xff] }
 0x182   : > { %1275 = vmatprep.subr.mxu1 %v673_v39 }
 0x183   : > { %1276 = vmatpush3.msra.mxu1 %v673_v39 }
 0x184   : > { %1277 = vmatprep.subr.mxu1 %v672_v40 }
 0x185   : > { %1278 = vmatpush3.msra.mxu1 %v672_v40 }
 0x186   : > { %1279 = vmatprep.subr.mxu1 %v671_v41 }
 0x187   : > { %1280 = vmatpush3.msra.mxu1 %v671_v41 }
 0x188   : > { %1281 = vmatprep.subr.mxu1 %v670_v42 }
 0x189   : > { %1282 = vmatpush3.msra.mxu1 %v670_v42 }
 0x18a   : > { %1283 = vmatprep.subr.mxu1 %v669_v43 }
 0x18b   : > { %1284 = vmatpush3.msra.mxu1 %v669_v43 }
 0x18c   : > { %1285 = vmatprep.subr.mxu1 %v668_v44 }
 0x18d   : > { %1286 = vmatpush3.msra.mxu1 %v668_v44 }
 0x22e   : > { %v1254_v45 = vpop.f32.mrf.mxu1 }
 0x230   : > { %v614_v46 = vpop.f32.mrf.mxu1 }
 0x231   : > { %v625_v47 = vadd.f32 %v1254_v45, %v614_v46 }
 0x233   : > { %v626_v48 = vrot.slane %v625_v47, 4 }
 0x235   : > { %v627_v49 = vadd.f32 %v626_v48, %v625_v47 }
 0x237   : > { %v628_v50 = vrot.slane %v627_v49, 2 }
 0x239   : > { %v629_v51 = vadd.f32 %v628_v50, %v627_v49 }
 0x23b   : > { %v630_v52 = vrot.slane %v629_v51, 1 }
 0x23d   : > { %v631_v53 = vadd.f32 %v630_v52, %v629_v51 }
 0x23f   : > { %v632_v54 = vmul.f32 0.0625, %v631_v53 }
 0x241   : > { %v633_v55 = vsub.f32 %v614_v46, %v632_v54  ;;  %v634_v56 = vsub.f32 %v1254_v45, %v632_v54 }
 0x243   : > { %v635_v57 = vmul.f32 %v633_v55, %v633_v55  ;;  %v636_v58 = vmul.f32 %v634_v56, %v634_v56 }
 0x245   : > { %v637_v59 = vadd.f32 %v636_v58, %v635_v57 }
 0x247   : > { %v638_v60 = vrot.slane %v637_v59, 4 }
 0x249   : > { %v639_v61 = vadd.f32 %v638_v60, %v637_v59 }
 0x24b   : > { %v640_v62 = vrot.slane %v639_v61, 2 }
 0x24d   : > { %v641_v63 = vadd.f32 %v640_v62, %v639_v61  ;;  %v834_v62 = vld [vmem:[%s1928_s7] sm:$0x1] }
 0x24f   : > { %v642_v0 = vrot.slane %v641_v63, 1 }
 0x251   : > { %v643_v1 = vadd.f32 %v642_v0, %v641_v63 }
 0x253   : > { %v644_v2 = vmul.f32 0.0625, %v643_v1 }
 0x255   : > { %v645_v3 = vadd.f32 1e-05, %v644_v2  ;;  %v1192_v2 = vld [vmem:[%s1929_s8] ss:$0 sm:$0xff] }
 0x257   : > { %1419 = vrsqrt.f32 %v645_v3 }
 0x264   : > { %v1420_v8 = vpop.eup %1419 }
 0x265   : > { %v647_v9 = vmul.f32 %v1420_v8, %v623_v6 }
 0x267   : > { %v652_v10 = vrot.slane %v647_v9, %v651_v7 }
 0x269   : > { %v654_v12 = vmul.f32 %v652_v10, %v633_v55  ;;  %v655_v13 = vmul.f32 %v652_v10, %v634_v56 }
 0x26b   : > { %v662_v14 = vadd.f32 %v1189_v11, %v654_v12  ;;  %v663_v15 = vadd.f32 %v1189_v11, %v655_v13 }
 0x26d   : > { %v664_v16 = vmul.f32 0.01, %v662_v14  ;;  %v665_v17 = vmul.f32 0.01, %v663_v15 }
 0x26f   : > { %v666_v18 = vmax.f32 %v662_v14, %v664_v16  ;;  %v667_v19 = vmax.f32 %v663_v15, %v665_v17 }
 0x271   : > { %1287 = vmatprep.mubr.f32.mxu1 %v666_v18 }
 0x272   : > { %1288 = vmatmul.mubr.f32.vlgmr.msra.gmra.mxu1 %v667_v19 }
 0x273   : > { %1294 = vmatprep.mubr.msk.f32.mxu1 %vm460_vm0, %v1867_v23 }
 0x332   : > { %v1289_v20 = vpop.f32.mrf.mxu1 }
 0x333   : > { %1290 = vmatprep.subr.mxu1 %v1289_v20 }
 0x334   : > { %v750_v21 = vpop.f32.mrf.mxu1  ;;  %1291 = vmatpush3.msra.mxu1 %v1289_v20 }
 0x335   : > { %1292 = vmatprep.subr.mxu1 %v750_v21 }
 0x336   : > { %1293 = vmatpush3.msra.mxu1 %v750_v21 }
 0x337   : > { %1295 = vmatmul.mubr.msk.f32.vlgmr.msra.gmra.mxu1 %vm460_vm0, %v1872_v28 }
 0x338   : > { %1336 = vmatprep.mubr.msk.f32.mxu1 %vm460_vm0, %v1867_v23  ;;  %v887_v23 = vld [vmem:[#allocation9 + $0x40] sm:$0xff] }
 0x339   : > { %1311 = vmatprep.subr.mxu0 %v887_v23 }
 0x33a   : > { %1312 = vmatpush3.msra.mxu0 %v887_v23 }
 0x33b   : > { %1313 = vmatprep.subr.mxu0 %v886_v31 }
 0x33c   : > { %1314 = vmatpush3.msra.mxu0 %v886_v31 }
 0x33d   : > { %1315 = vmatprep.subr.mxu0 %v885_v32 }
 0x33e   : > { %1316 = vmatpush3.msra.mxu0 %v885_v32 }
 0x33f   : > { %1317 = vmatprep.subr.mxu0 %v884_v33 }
 0x340   : > { %1318 = vmatpush3.msra.mxu0 %v884_v33 }
 0x341   : > { %1319 = vmatprep.subr.mxu0 %v883_v34 }
 0x342   : > { %1320 = vmatpush3.msra.mxu0 %v883_v34 }
 0x343   : > { %1321 = vmatprep.subr.mxu0 %v882_v35 }
 0x344   : > { %1322 = vmatpush3.msra.mxu0 %v882_v35 }
 0x345   : > { %1323 = vmatprep.subr.mxu0 %v881_v36 }
 0x346   : > { %1324 = vmatpush3.msra.mxu0 %v881_v36 }
 0x347   : > { %1325 = vmatprep.subr.mxu0 %v880_v37 }
 0x348   : > { %1326 = vmatpush3.msra.mxu0 %v880_v37 }
 0x349   : > { %1327 = vmatprep.subr.mxu0 %v879_v38 }
 0x34a   : > { %1328 = vmatpush3.msra.mxu0 %v879_v38 }
 0x3f7   : > { %v1296_v39 = vpop.f32.mrf.mxu1 }
 0x3f9   : > { %v825_v40 = vpop.f32.mrf.mxu1 }
 0x3fa   : > { %v836_v41 = vadd.f32 %v1296_v39, %v825_v40 }
 0x3fc   : > { %v837_v42 = vrot.slane %v836_v41, 4 }
 0x3fe   : > { %v838_v43 = vadd.f32 %v837_v42, %v836_v41 }
 0x400   : > { %v839_v44 = vrot.slane %v838_v43, 2 }
 0x402   : > { %v840_v45 = vadd.f32 %v839_v44, %v838_v43 }
 0x404   : > { %v841_v46 = vrot.slane %v840_v45, 1 }
 0x406   : > { %v842_v47 = vadd.f32 %v841_v46, %v840_v45 }
 0x408   : > { %v843_v48 = vmul.f32 0.0625, %v842_v47 }
 0x40a   : > { %v844_v49 = vsub.f32 %v825_v40, %v843_v48  ;;  %v845_v50 = vsub.f32 %v1296_v39, %v843_v48 }
 0x40c   : > { %v846_v51 = vmul.f32 %v844_v49, %v844_v49  ;;  %v847_v52 = vmul.f32 %v845_v50, %v845_v50 }
 0x40e   : > { %v848_v53 = vadd.f32 %v847_v52, %v846_v51 }
 0x410   : > { %v849_v54 = vrot.slane %v848_v53, 4 }
 0x412   : > { %v850_v55 = vadd.f32 %v849_v54, %v848_v53 }
 0x414   : > { %v851_v56 = vrot.slane %v850_v55, 2 }
 0x416   : > { %v852_v57 = vadd.f32 %v851_v56, %v850_v55 }
 0x418   : > { %v853_v58 = vrot.slane %v852_v57, 1 }
 0x41a   : > { %v854_v59 = vadd.f32 %v853_v58, %v852_v57 }
 0x41c   : > { %v855_v60 = vmul.f32 0.0625, %v854_v59 }
 0x41e   : > { %v856_v61 = vadd.f32 1e-05, %v855_v60 }
 0x420   : > { %1421 = vrsqrt.f32 %v856_v61 }
 0x42d   : > { %v1422_v63 = vpop.eup %1421 }
 0x42e   : > { %v858_v0 = vmul.f32 %v1422_v63, %v834_v62 }
 0x430   : > { %v863_v1 = vrot.slane %v858_v0, %v651_v7 }
 0x432   : > { %v865_v3 = vmul.f32 %v863_v1, %v844_v49  ;;  %v866_v4 = vmul.f32 %v863_v1, %v845_v50 }
 0x434   : > { %v873_v6 = vadd.f32 %v1192_v2, %v865_v3  ;;  %v874_v8 = vadd.f32 %v1192_v2, %v866_v4 }
 0x436   : > { %v876_v9 = vmul.f32 0.01, %v874_v8  ;;  %v875_v10 = vmul.f32 0.01, %v873_v6 }
 0x438   : > { %v878_v11 = vmax.f32 %v874_v8, %v876_v9  ;;  %v877_v12 = vmax.f32 %v873_v6, %v875_v10 }
 0x43a   : > { %1329 = vmatprep.mubr.f32.mxu0 %v877_v12 }
 0x43b   : > { %1330 = vmatmul.mubr.f32.vlgmr.msra.gmra.mxu0 %v878_v11 }
 0x4fb   : > { %v1331_v13 = vpop.f32.mrf.mxu0 }
 0x4fc   : > { %1332 = vmatprep.subr.mxu1 %v1331_v13 }
 0x4fd   : > { %v961_v5 = vpop.f32.mrf.mxu0  ;;  %1333 = vmatpush3.msra.mxu1 %v1331_v13 }
 0x4fe   : > { %1334 = vmatprep.subr.mxu1 %v961_v5 }
 0x4ff   : > { %1335 = vmatpush3.msra.mxu1 %v961_v5 }
 0x500   : > { %1337 = vmatmul.mubr.msk.f32.vlgmr.msra.gmra.mxu1 %vm460_vm0, %v1872_v28 }
 0x5c0   : > { %v1338_v7 = vpop.f32.mrf.mxu1 }
 0x5c1   : > { %1046 = vst [vmem:[%s435_s16 + $0x8] sm:$0xff] %v1338_v7 }
 0x5c2   : > { %v1036_v14 = vpop.f32.mrf.mxu1 }
 0x5c3   : > { %1045 = vst [vmem:[%s435_s16] sm:$0xff] %v1036_v14 }
 0x5c4 PF: > { %p23_p0 = scmp.ge.s32.totalorder %s1744_s20, 6   ;;  %s1955_s30 = smov %s1595_s10 }
 0x5c5   : > { %s1956_s10 = smov %s1599_s11  ;;  %s1957_s11 = smov %s1754_s23 }
 0x5c6   : > { %s1958_s12 = smov %s1744_s20  ;;  %25 = sbr.rel (!%p23_p0) target bundleno = 11 (0xb), region = 121 }
 0x5cb   :  { %1068 = vsyncpa [#allocation3], 1 }
 0x5cc   :  { %1070 = vsyncpa [#allocation3 + $0x1], 1 }
 0x5cd   :  { %1071 = vsyncpa [#allocation5], 1 }
 0x5ce   :  { %1073 = vsyncpa [#allocation5 + $0x1], 1 }
 0x5cf   :  { %1074 = vsyncpa [#allocation8], 1 }

</bundles_post_ra>
